<compile_context>
chip_gen: v7x
topology: tpu7x:2x2x1
jax: 0.10.0
libtpu: 0.0.40
codegen_flags: <defaults>
</compile_context>

<pallas_src>
import functools

import jax
import jax.numpy as jnp
from jax.experimental import pallas as pl
from jax.experimental.pallas import tpu as pltpu


# ---------------------------------------------------------------------------
# Kernels
# ---------------------------------------------------------------------------

def _upsample_rows_kernel(x_ref, o_ref, *, scale, C):
    """x_ref: (TR, C); o_ref: (TR, scale*C); out[:, s*C + c] = x[:, c]."""
    x = x_ref[...]
    if C % 128 == 0:
        # Each slice store starts at a lane-aligned (multiple-of-128) offset:
        # full-width unmasked vst, no XLU rotate.  Static, tiny unroll.
        for s in range(scale):
            o_ref[:, s * C:(s + 1) * C] = x
    else:
        # Build the interleaved tile once and issue one full-block store
        # (fully unmasked when scale*C % 128 == 0).
        o_ref[...] = jnp.concatenate([x] * scale, axis=-1)


def _copy_kernel(x_ref, o_ref):
    """Pure copy: one (TR, TC) chunk per grid step (lane-axis fallback path)."""
    o_ref[...] = x_ref[...]


# ---------------------------------------------------------------------------
# Tile-size / budget selection
# ---------------------------------------------------------------------------

def _vmem_budget_bytes():
    """Generation-specific budget for the double-buffered kernel blocks."""
    try:
        cap = int(pltpu.get_tpu_info().vmem_capacity_bytes)
    except Exception:
        cap = 64 << 20                      # unknown -> assume smallest (v7x 64 MiB)
    # ~24 MiB of blocks on 64 MiB-VMEM parts (v7x), ~48 MiB on 128 MiB parts
    # (v5e / v6e); leaves headroom for Mosaic internal scratch.
    return (48 << 20) if cap >= (96 << 20) else (24 << 20)


def _pick_tile_rows(N, row_cols, scale, itemsize, budget_bytes,
                    target_out_bytes=4 << 20, min_out_bytes=1 << 20, min_steps=8):
    """Rows per grid step.

    `row_cols` is the input block width; the output block width is
    scale*row_cols.  Sized by bytes (not rows): aim for ~target_out_bytes of
    output per step, capped by a double-buffered VMEM budget, and keep
    >= min_steps grid steps as long as each step still moves >= min_out_bytes.
    """
    sub = max(8, 32 // itemsize)            # sublane multiple: f32 8, bf16 16, i8 32
    if N <= sub:
        return int(N)                       # equals full array dim -> always legal
    in_row = row_cols * itemsize
    out_row = scale * row_cols * itemsize
    tr_cap = max(1, budget_bytes // (2 * (in_row + out_row)))   # double-buffered cap
    tr = min(tr_cap, max(1, target_out_bytes // out_row), N)
    if (N + tr - 1) // tr < min_steps:
        tr_steps = (N + min_steps - 1) // min_steps    # rows/step for ~min_steps steps
        tr_floor = max(1, min_out_bytes // out_row)    # keep >= ~1 MiB of output/step
        tr = min(tr, max(tr_steps, tr_floor))
    tr = max(sub, (tr // sub) * sub)        # keep dtype sublane alignment
    return int(min(tr, N))


def _pick_tile_c(C, itemsize, sub, budget_bytes):
    """Lane-axis tile for the fallback path: largest divisor of C (preferring a
    multiple of 128) whose double-buffered (sub, TC) in + (sub, TC) out
    footprint fits the budget."""
    def fits(tc):
        return 4 * sub * tc * itemsize <= budget_bytes
    best_any = None
    for m in range(1, C + 1):
        if C % m:
            continue
        tc = C // m
        if not fits(tc):
            continue
        if tc % 128 == 0:
            return int(tc)                  # largest lane-aligned divisor that fits
        if best_any is None:
            best_any = tc                   # largest (possibly masked) divisor that fits
        if tc < 128:
            break                           # no 128-multiple divisor can exist below this
    return int(best_any) if best_any is not None else 1


# ---------------------------------------------------------------------------
# Wrapper
# ---------------------------------------------------------------------------

def upsample_nearest(x, scale_factor, *, tile_rows=None, tile_c=None):
    """Nearest upsampling along axis 1 of a (B, L, C) array.

    Equivalent to PyTorch:
      permute(0,2,1) -> nn.Upsample(scale_factor, 'nearest') -> permute(0,2,1)
    i.e. jnp.repeat(x, scale, axis=1).

    Passing `tile_c` forces the lane-axis (C-split) fallback path.
    """
    # TODO(synk): PyTorch nn.Upsample also accepts non-integer scale factors
    # (floor(i/scale) source indexing); only integer scales are supported here.
    if float(scale_factor) != int(scale_factor):
        raise ValueError("upsample_nearest only supports integer scale factors")
    scale = int(scale_factor)
    if scale < 1:
        raise ValueError("scale_factor must be >= 1")

    B, L, C = x.shape
    N = B * L
    itemsize = jnp.dtype(x.dtype).itemsize
    sub = max(8, 32 // itemsize)
    budget = _vmem_budget_bytes()

    x2 = x.reshape(N, C)                    # free row-major reshape
    cost = pl.CostEstimate(flops=0, transcendentals=0,
                           bytes_accessed=int((1 + scale) * N * C * itemsize))

    # Does the lane-dense path fit the budget even at the minimum row tile?
    min_rows = min(N, sub)
    lane_dense_min_bytes = 2 * min_rows * (1 + scale) * C * itemsize
    use_c_split = (tile_c is not None) or (lane_dense_min_bytes > budget)

    if not use_c_split:
        # --- Main path: lane-dense (TR, scale*C) output blocks -------------
        TR = int(tile_rows) if tile_rows is not None else _pick_tile_rows(
            N, C, scale, itemsize, budget)
        vmem_needed = 2 * TR * (1 + scale) * C * itemsize + (4 << 20)
        kernel = functools.partial(_upsample_rows_kernel, scale=scale, C=C)
        y = pl.pallas_call(
            kernel,
            out_shape=jax.ShapeDtypeStruct((N, scale * C), x.dtype),
            grid=(pl.cdiv(N, TR),),
            in_specs=[pl.BlockSpec((TR, C), lambda r: (r, 0))],
            out_specs=pl.BlockSpec((TR, scale * C), lambda r: (r, 0)),
            compiler_params=pltpu.CompilerParams(
                dimension_semantics=("parallel",),
                vmem_limit_bytes=int(max(vmem_needed, 32 << 20))),
            cost_estimate=cost,
        )(x2)
    else:
        # --- Fallback path: lane-axis tiling, pure-copy kernel -------------
        TC = int(tile_c) if tile_c is not None else _pick_tile_c(
            C, itemsize, sub, budget)
        if C % TC != 0:
            raise ValueError("tile_c must divide C")
        n_c = C // TC
        TR = int(tile_rows) if tile_rows is not None else _pick_tile_rows(
            N, TC, 1, itemsize, budget)
        vmem_needed = 4 * TR * TC * itemsize + (4 << 20)
        # Grid: rows (outer), C-chunks, scale-copy (inner).  Keeping the scale
        # axis innermost lets Pallas skip re-fetching the unchanged input block.
        y = pl.pallas_call(
            _copy_kernel,
            out_shape=jax.ShapeDtypeStruct((N, scale * C), x.dtype),
            grid=(pl.cdiv(N, TR), n_c, scale),
            in_specs=[pl.BlockSpec((TR, TC), lambda r, c, s: (r, c))],
            out_specs=pl.BlockSpec((TR, TC),
                                   lambda r, c, s, n_c=n_c: (r, s * n_c + c)),
            compiler_params=pltpu.CompilerParams(
                dimension_semantics=("parallel", "parallel", "arbitrary"),
                vmem_limit_bytes=int(max(vmem_needed, 32 << 20))),
            cost_estimate=cost,
        )(x2)

    # Free (contiguous, row-major) reshape: (B*L, scale*C) -> (B, L*scale, C).
    return y.reshape(B, L * scale, C)


# ---------------------------------------------------------------------------
# Self-test
# ---------------------------------------------------------------------------

if __name__ == "__main__":
    key = jax.random.PRNGKey(0)
    k1, k2, k3, k4 = jax.random.split(key, 4)

    # Test 1: module-like small shape (B, L, C) channel-last, scale 2.
    B, L, C, scale = 2, 8, 32, 2
    x1 = jax.random.normal(k1, (B, L, C), dtype=jnp.float32)
    out1 = jax.block_until_ready(upsample_nearest(x1, scale))
    ref1 = jnp.repeat(x1, scale, axis=1)  # == permute -> nn.Upsample('nearest') -> permute
    assert out1.shape == (B, L * scale, C), out1.shape
    assert jnp.array_equal(out1, ref1), "mismatch vs reference (test 1)"

    # Test 2: lane-aligned C (128), scale 3, explicit tile with a partial tail
    # row-tile (N = 74, TR = 16 -> 5 steps, last has 10 rows).
    B2, L2, C2, s2 = 2, 37, 128, 3
    x2 = jax.random.normal(k2, (B2, L2, C2), dtype=jnp.float32)
    out2 = jax.block_until_ready(upsample_nearest(x2, s2, tile_rows=16))
    ref2 = jnp.repeat(x2, s2, axis=1)
    assert out2.shape == (B2, L2 * s2, C2), out2.shape
    assert jnp.array_equal(out2, ref2), "mismatch vs reference (test 2)"

    # Test 3: C not a multiple of 128 but scale*C is -> single full-lane store.
    B3, L3, C3, s3 = 2, 24, 64, 2
    x3 = jax.random.normal(k3, (B3, L3, C3), dtype=jnp.float32)
    out3 = jax.block_until_ready(upsample_nearest(x3, s3))
    ref3 = jnp.repeat(x3, s3, axis=1)
    assert out3.shape == (B3, L3 * s3, C3), out3.shape
    assert jnp.array_equal(out3, ref3), "mismatch vs reference (test 3)"

    # Test 4: force the lane-axis (C-split) fallback path, with a partial tail.
    B4, L4, C4, s4 = 2, 20, 256, 2
    x4 = jax.random.normal(k4, (B4, L4, C4), dtype=jnp.float32)
    out4 = jax.block_until_ready(upsample_nearest(x4, s4, tile_rows=16, tile_c=128))
    ref4 = jnp.repeat(x4, s4, axis=1)
    assert out4.shape == (B4, L4 * s4, C4), out4.shape
    assert jnp.array_equal(out4, ref4), "mismatch vs reference (test 4)"

    print("KERNEL_OK")
</pallas_src>

<mosaic_0001>
module attributes {stable_mosaic.version = 11 : i64} {
  func.func @_upsample_rows_kernel(%arg0: i32, %arg1: memref<16x32xf32, #tpu.memory_space<vmem>>, %arg2: memref<16x64xf32, #tpu.memory_space<vmem>>) attributes {dimension_semantics = [#tpu.dimension_semantics<parallel>], iteration_bounds = array<i64: 1>, scalar_prefetch = 0 : i64, scratch_operands = 0 : i64, tpu.core_type = #tpu.core_type<tc>, window_params = [{transform_indices = @transform_0, window_bounds = array<i64: 16, 32>}, {transform_indices = @transform_1, window_bounds = array<i64: 16, 64>}]} {
    %c0 = arith.constant 0 : index
    %c0_0 = arith.constant 0 : index
    %0 = vector.load %arg1[%c0, %c0_0] : memref<16x32xf32, #tpu.memory_space<vmem>>, vector<16x32xf32>
    %1 = tpu.concatenate %0, %0 in 1 : vector<16x32xf32>, vector<16x32xf32> -> vector<16x64xf32>
    %c0_1 = arith.constant 0 : index
    %c0_2 = arith.constant 0 : index
    %2 = vector.load %arg2[%c0_1, %c0_2] : memref<16x64xf32, #tpu.memory_space<vmem>>, vector<16x64xf32>
    tpu.vector_store %arg2[%c0_1, %c0_2], %1 {strides = array<i32>} : memref<16x64xf32, #tpu.memory_space<vmem>>, vector<16x64xf32>,
    return
  }
  func.func @transform_0(%arg0: i32) -> (i32, i32) {
    %c0_i32 = arith.constant 0 : i32
    %c0_i32_0 = arith.constant 0 : i32
    return %arg0, %c0_i32 : i32, i32
  }
  func.func @transform_1(%arg0: i32) -> (i32, i32) {
    %c0_i32 = arith.constant 0 : i32
    %c0_i32_0 = arith.constant 0 : i32
    return %arg0, %c0_i32 : i32, i32
  }
}

</mosaic_0001>

<bundles_post_ra>
// kernel: tpu_custom_call.1
= control target key start
LH: loop header
LB: loop body
LE: loop exit
PB: predicated region body
PF: predicated region fallthrough
CT: control target
= control target key end

     0   :  { %6 = vsyncpa [#allocation3], 0  ;;  %s154_s0 = inlined_call_operand.hbm [shape: f32[16,32], index: 0, kind: input, shape index: {}]   ;;  %s155_s1 = inlined_call_operand.hbm [shape: f32[16,64], index: 1, kind: output, shape index: {}]  }
   0x1   :  { %7 = vsyncpa [#allocation4], 0  ;;  %s109_s6 = smov [#allocation2]   ;;  %s61_s10 = scalar_lea.hbm %s154_s0, 256 }
   0x2   :  { %s13_s7 = sshll.u32 %s109_s6, 4  ;;  %p62_p0 = scmp.ne.s32.totalorder %s154_s0, %s61_s10  ;;  %s14_s7 = int_to_ptr.vmem [resolvable:$true] %s13_s7 }
   0x3   :  { %p65_p1 = scmp.lt.u32.totalorder %s61_s10, %s154_s0 }
   0x5   :  { %p67_p2 = pnand %p65_p1, %p62_p0 }
   0x7   :  { %70 = shalt.err (!%p67_p2)
}
   0x8   :  { %s71_s15 = scalar_lea.vmem %s14_s7, 256  ;;  %p76_p4 = scmp.lt.s32.totalorder %s14_s7, %s14_s7 }
   0x9   :  { %p72_p3 = scmp.ne.s32.totalorder %s14_s7, %s71_s15  ;;  %p77_p5 = scmp.lt.s32.totalorder %s71_s15, %s71_s15 }
   0xb   :  { %p78_p6 = por %p77_p5, %p76_p4 }
   0xd   :  { %p79_p7 = pnand %p78_p6, %p72_p3 }
   0xf   :  { %82 = shalt.err (!%p79_p7)
}
  0x10   :  { %s110_s16 = smov 128   ;;  %s111_s17 = smov 8  }
  0x11   :  { %19 = dma.hbm_to_vmem [thread:$0]  %s154_s0, 256, %s14_s7, [#allocation3], %s110_s16, %s110_s16, %s111_s17  }
  0x12   :  { %105 = dma.done.wait [#allocation3], 256  }
  0x13   :  { %106 = vsyncadd [#allocation3], 4294967040  ;;  %v23_v0 = vld [vmem:[#allocation2] sm:$0xff]  ;;  %s112_s20 = smov 32   ;;  %v24_v1 = vld [vmem:[#allocation2 + $0x8] sm:$0xff]  ;;  %vm33_vm0 = vcmask 261120  }
  0x14   :  { %27 = vrot.lane.b32.xlu0 %v23_v0, %s112_s20  ;;  %vm36_vm1 = vcmask 523264   ;;  %s113_s21 = smov [#allocation5]  }
  0x15   :  { %s44_s22 = sshll.u32 %s113_s21, 4  ;;  %s45_s22 = int_to_ptr.vmem [resolvable:$true] %s44_s22 }
  0x16   :  { %s83_s23 = scalar_lea.vmem %s45_s22, 256  ;;  %p88_p9 = scmp.lt.s32.totalorder %s45_s22, %s45_s22 }
  0x17   :  { %p84_p8 = scmp.ne.s32.totalorder %s45_s22, %s83_s23  ;;  %p89_p10 = scmp.lt.s32.totalorder %s83_s23, %s83_s23 }
  0x18   :  { %29 = vrot.lane.b32.xlu0 %v24_v1, %s112_s20 }
  0x19   :  { %p90_p11 = por %p89_p10, %p88_p9 }
  0x1b   :  { %p91_p12 = pnand %p90_p11, %p84_p8 }
  0x86   :  { %v28_v2 = vpop.permute.xlu0 %27 }
  0x87   :  { %v34_v3 = vsel %vm33_vm0, %v23_v0, %v28_v2 }
  0x88   :  { %37 = vst.msk [vmem:[#allocation5] sm:$0xff] %vm36_vm1, %v34_v3 }
  0x8a   :  { %v30_v4 = vpop.permute.xlu0 %29 }
  0x8b   :  { %v35_v5 = vsel %vm33_vm0, %v24_v1, %v30_v4 }
  0x8c   :  { %38 = vst.msk [vmem:[#allocation5 + $0x8] sm:$0xff] %vm36_vm1, %v35_v5 }
  0x8d   :  { %94 = shalt.err (!%p91_p12)
}
  0x8e   :  { %s95_s25 = scalar_lea.hbm %s155_s1, 256 }
  0x8f   :  { %p96_p13 = scmp.ne.s32.totalorder %s155_s1, %s95_s25  ;;  %p99_p0 = scmp.lt.u32.totalorder %s95_s25, %s155_s1 }
  0x91   :  { %p101_p1 = pnand %p99_p0, %p96_p13 }
  0x93   :  { %104 = shalt.err (!%p101_p1)
}
  0x94   :  { %50 = dma.vmem_to_hbm [thread:$0]  %s45_s22, 256, %s155_s1, [#allocation4], %s110_s16, %s110_s16, %s111_s17  }
  0x95   :  { %107 = dma.done.wait [#allocation4], 256  }
  0x96   :  { %108 = vsyncadd [#allocation4], 4294967040 }
  0x97   :  { %54 = vsyncpa [#allocation3], 1 }
  0x98   :  { %55 = vsyncpa [#allocation4], 1 }

</bundles_post_ra>
